<compile_context>
chip_gen: v7x
topology: tpu7x:2x2x1
jax: 0.10.0
libtpu: 0.0.40
codegen_flags: <defaults>
</compile_context>

<pallas_src>
import jax
import jax.numpy as jnp
from jax.experimental import pallas as pl
from jax.experimental.pallas import tpu as pltpu


def _make_scalar_mix_kernel(n_layers):
    def kernel(s_ref, *refs):
        # s_ref            : (n_layers,) SMEM f32  -- gamma * softmax(w)
        # refs[:n_layers]  : (tile_m, H) VMEM tiles, one per layer
        # refs[n_layers]   : (tile_m, H) VMEM output tile
        x_refs = refs[:n_layers]
        o_ref = refs[n_layers]
        acc = s_ref[0] * x_refs[0][...].astype(jnp.float32)
        for k in range(1, n_layers):
            acc = acc + s_ref[k] * x_refs[k][...].astype(jnp.float32)
        o_ref[...] = acc.astype(o_ref.dtype)

    return kernel


def _physical_vmem_bytes():
    """Best-effort physical VMEM capacity; conservative 128 MiB fallback."""
    try:
        info = pltpu.get_tpu_info()
        v = getattr(info, "vmem_capacity_bytes", None)
        if v:
            return int(v)
    except Exception:
        pass
    return 128 * 1024 * 1024


def scalar_mix(tensors, weights, gamma, *, tile_m=None, vmem_budget_bytes=None):
    """tensors: list of N arrays of identical shape (B, S, H)."""
    n_layers = len(tensors)
    B, S, H = tensors[0].shape
    M = B * S
    dtype = tensors[0].dtype
    itemsize = jnp.dtype(dtype).itemsize

    # Flatten batch*seq (free reshape on contiguous row-major data).
    xs = [t.reshape(M, H) for t in tensors]

    # Precompute gamma * softmax(w) once, outside the grid loop.
    s = (gamma.reshape(()).astype(jnp.float32)
         * jax.nn.softmax(weights.astype(jnp.float32), axis=-1))

    # --- VMEM budgeting (device-aware) -------------------------------------
    phys = _physical_vmem_bytes()
    if vmem_budget_bytes is None:
        # 64 MiB parts (v7x): keep a modest budget; 128 MiB parts (v5e/v6e):
        # go big so per-step DMA amortizes the ~0.35 us grid-step overhead.
        vmem_budget_bytes = (24 << 20) if phys <= (64 << 20) else (64 << 20)
    # vmem_limit must never exceed physical VMEM (keep ~8 MiB slack).
    vmem_limit = min(max(32 << 20, vmem_budget_bytes + (16 << 20)),
                     phys - (8 << 20))
    # And the sizing budget must fit under the limit.
    vmem_budget_bytes = min(vmem_budget_bytes, vmem_limit - (8 << 20))

    # Sublane packing: 8 rows for 4-byte, 16 for 2-byte, 32 for 1-byte dtypes.
    sublane = {4: 8, 2: 16, 1: 32}.get(itemsize, 8)

    def round_up(x, m):
        return ((x + m - 1) // m) * m

    if tile_m is None:
        # Double-buffered native-dtype I/O streams (N inputs + 1 output) ...
        per_row_bytes = 2 * (n_layers + 1) * H * itemsize
        # ... plus the in-kernel f32 accumulator / upcast temporaries, which
        # live in Mosaic internal VMEM scratch (they don't fit in vregs).
        per_row_bytes += (3 if dtype != jnp.float32 else 2) * 4 * H
        tile_m = max(sublane,
                     (vmem_budget_bytes // per_row_bytes) // sublane * sublane)
        tile_m = min(tile_m, 4096)

    # Keep the grid >= ~4 blocks when M is large enough: shards across v7x's
    # two TensorCores and gives the double-buffer pipeline work to overlap.
    min_blocks = 4
    if M >= min_blocks * sublane:
        tile_m = min(tile_m, round_up(pl.cdiv(M, min_blocks), sublane))

    # Never exceed the (sublane-rounded) problem size.
    m_cap = round_up(M, sublane) if M >= sublane else M
    tile_m = min(tile_m, m_cap)

    grid = (pl.cdiv(M, tile_m),)  # ragged tail handled by Pallas block padding

    # NOTE: H should be a multiple of 128 for lane-dense (unmasked) stores;
    # otherwise keep the full-H block as done here (do not sub-tile H).
    x_spec = pl.BlockSpec((tile_m, H), lambda i: (i, 0))
    out = pl.pallas_call(
        _make_scalar_mix_kernel(n_layers),
        out_shape=jax.ShapeDtypeStruct((M, H), dtype),
        grid=grid,
        in_specs=[pl.BlockSpec(memory_space=pltpu.SMEM)]  # mixing scalars
        + [x_spec] * n_layers,                            # layer activations
        out_specs=pl.BlockSpec((tile_m, H), lambda i: (i, 0)),
        compiler_params=pltpu.CompilerParams(
            dimension_semantics=("parallel",),
            vmem_limit_bytes=vmem_limit),
    )(s, *xs)

    return out.reshape(B, S, H)


if __name__ == "__main__":
    key = jax.random.PRNGKey(0)
    n_layers = 4
    B, S, H = 2, 8, 128

    # Deterministic parameter init, matching ScalarMix.__init__:
    weights = jnp.zeros((n_layers,), jnp.float32)   # nn.Parameter(torch.zeros(n_layers))
    gamma = jnp.array([1.0], jnp.float32)           # nn.Parameter(torch.tensor([1.0]))

    keys = jax.random.split(key, n_layers)
    tensors = [jax.random.normal(k, (B, S, H), jnp.float32) for k in keys]

    # f32 path
    out = scalar_mix(tensors, weights, gamma)
    out = jax.block_until_ready(out)
    sw = jax.nn.softmax(weights)
    ref = gamma[0] * sum(w * t for w, t in zip(sw, tensors))
    assert out.shape == (B, S, H)
    assert out.dtype == jnp.float32
    assert jnp.allclose(out, ref, atol=1e-5, rtol=1e-5)

    # bf16 path (activations stay bf16 in HBM, f32 accumulate inside kernel)
    tensors_bf16 = [t.astype(jnp.bfloat16) for t in tensors]
    out_bf16 = jax.block_until_ready(scalar_mix(tensors_bf16, weights, gamma))
    ref_bf16 = gamma[0] * sum(w * t.astype(jnp.float32)
                              for w, t in zip(sw, tensors_bf16))
    assert out_bf16.dtype == jnp.bfloat16
    assert jnp.allclose(out_bf16.astype(jnp.float32), ref_bf16,
                        atol=2e-2, rtol=2e-2)

    print("KERNEL_OK")
</pallas_src>

<mosaic_0001>
module attributes {stable_mosaic.version = 11 : i64} {
  func.func @kernel(%arg0: i32, %arg1: memref<4xf32, #tpu.memory_space<smem>>, %arg2: memref<16x128xf32, #tpu.memory_space<vmem>>, %arg3: memref<16x128xf32, #tpu.memory_space<vmem>>, %arg4: memref<16x128xf32, #tpu.memory_space<vmem>>, %arg5: memref<16x128xf32, #tpu.memory_space<vmem>>, %arg6: memref<16x128xf32, #tpu.memory_space<vmem>>) attributes {dimension_semantics = [#tpu.dimension_semantics<parallel>], iteration_bounds = array<i64: 1>, scalar_prefetch = 0 : i64, scratch_operands = 0 : i64, tpu.core_type = #tpu.core_type<tc>, window_params = [{transform_indices = @transform_0, window_bounds = array<i64: 4>}, {transform_indices = @transform_1, window_bounds = array<i64: 16, 128>}, {transform_indices = @transform_2, window_bounds = array<i64: 16, 128>}, {transform_indices = @transform_3, window_bounds = array<i64: 16, 128>}, {transform_indices = @transform_4, window_bounds = array<i64: 16, 128>}, {transform_indices = @transform_5, window_bounds = array<i64: 16, 128>}]} {
    %c0 = arith.constant 0 : index
    %0 = memref.load %arg1[%c0] : memref<4xf32, #tpu.memory_space<smem>>
    %c0_0 = arith.constant 0 : index
    %c0_1 = arith.constant 0 : index
    %1 = vector.load %arg2[%c0_0, %c0_1] : memref<16x128xf32, #tpu.memory_space<vmem>>, vector<16x128xf32>
    %2 = vector.broadcast %0 : f32 to vector<16x128xf32>
    %3 = arith.mulf %2, %1 : vector<16x128xf32>
    %c1 = arith.constant 1 : index
    %4 = memref.load %arg1[%c1] : memref<4xf32, #tpu.memory_space<smem>>
    %c0_2 = arith.constant 0 : index
    %c0_3 = arith.constant 0 : index
    %5 = vector.load %arg3[%c0_2, %c0_3] : memref<16x128xf32, #tpu.memory_space<vmem>>, vector<16x128xf32>
    %6 = vector.broadcast %4 : f32 to vector<16x128xf32>
    %7 = arith.mulf %6, %5 : vector<16x128xf32>
    %8 = arith.addf %3, %7 : vector<16x128xf32>
    %c2 = arith.constant 2 : index
    %9 = memref.load %arg1[%c2] : memref<4xf32, #tpu.memory_space<smem>>
    %c0_4 = arith.constant 0 : index
    %c0_5 = arith.constant 0 : index
    %10 = vector.load %arg4[%c0_4, %c0_5] : memref<16x128xf32, #tpu.memory_space<vmem>>, vector<16x128xf32>
    %11 = vector.broadcast %9 : f32 to vector<16x128xf32>
    %12 = arith.mulf %11, %10 : vector<16x128xf32>
    %13 = arith.addf %8, %12 : vector<16x128xf32>
    %c3 = arith.constant 3 : index
    %14 = memref.load %arg1[%c3] : memref<4xf32, #tpu.memory_space<smem>>
    %c0_6 = arith.constant 0 : index
    %c0_7 = arith.constant 0 : index
    %15 = vector.load %arg5[%c0_6, %c0_7] : memref<16x128xf32, #tpu.memory_space<vmem>>, vector<16x128xf32>
    %16 = vector.broadcast %14 : f32 to vector<16x128xf32>
    %17 = arith.mulf %16, %15 : vector<16x128xf32>
    %18 = arith.addf %13, %17 : vector<16x128xf32>
    %c0_8 = arith.constant 0 : index
    %c0_9 = arith.constant 0 : index
    %19 = vector.load %arg6[%c0_8, %c0_9] : memref<16x128xf32, #tpu.memory_space<vmem>>, vector<16x128xf32>
    tpu.vector_store %arg6[%c0_8, %c0_9], %18 {strides = array<i32>} : memref<16x128xf32, #tpu.memory_space<vmem>>, vector<16x128xf32>,
    return
  }
  func.func @transform_0(%arg0: i32) -> i32 {
    %c0_i32 = arith.constant 0 : i32
    %c0_i32_0 = arith.constant 0 : i32
    return %c0_i32 : i32
  }
  func.func @transform_1(%arg0: i32) -> (i32, i32) {
    %c0_i32 = arith.constant 0 : i32
    %c0_i32_0 = arith.constant 0 : i32
    return %arg0, %c0_i32 : i32, i32
  }
  func.func @transform_2(%arg0: i32) -> (i32, i32) {
    %c0_i32 = arith.constant 0 : i32
    %c0_i32_0 = arith.constant 0 : i32
    return %arg0, %c0_i32 : i32, i32
  }
  func.func @transform_3(%arg0: i32) -> (i32, i32) {
    %c0_i32 = arith.constant 0 : i32
    %c0_i32_0 = arith.constant 0 : i32
    return %arg0, %c0_i32 : i32, i32
  }
  func.func @transform_4(%arg0: i32) -> (i32, i32) {
    %c0_i32 = arith.constant 0 : i32
    %c0_i32_0 = arith.constant 0 : i32
    return %arg0, %c0_i32 : i32, i32
  }
  func.func @transform_5(%arg0: i32) -> (i32, i32) {
    %c0_i32 = arith.constant 0 : i32
    %c0_i32_0 = arith.constant 0 : i32
    return %arg0, %c0_i32 : i32, i32
  }
}

</mosaic_0001>

<bundles_post_ra>
// kernel: tpu_custom_call.1
= control target key start
LH: loop header
LB: loop body
LE: loop exit
PB: predicated region body
PF: predicated region fallthrough
CT: control target
= control target key end

     0   :  { %10 = vsyncpa [#allocation5], 0  ;;  %s405_s0 = inlined_call_operand.hbm [shape: f32[4], index: 0, kind: input, shape index: {}]   ;;  %s406_s1 = inlined_call_operand.hbm [shape: f32[16,128], index: 1, kind: input, shape index: {}]   ;;  %s407_s2 = inlined_call_operand.hbm [shape: f32[16,128], index: 2, kind: input, shape index: {}]   ;;  %s408_s3 = inlined_call_operand.hbm [shape: f32[16,128], index: 3, kind: input, shape index: {}]   ;;  %s409_s4 = inlined_call_operand.hbm [shape: f32[16,128], index: 4, kind: input, shape index: {}]   ;;  %s410_s5 = inlined_call_operand.hbm [shape: f32[16,128], index: 5, kind: output, shape index: {}]  }
   0x1   :  { %11 = vsyncpa [#allocation3], 0 }
   0x2   :  { %12 = vsyncpa [#allocation8], 0 }
   0x3   :  { %13 = vsyncpa [#allocation11], 0 }
   0x4   :  { %14 = vsyncpa [#allocation4], 0  ;;  %s280_s18 = smov [#allocation7]   ;;  %s281_s20 = smov [#allocation6]  }
   0x5   :  { %s40_s19 = sshll.u32 %s280_s18, 4  ;;  %s28_s21 = sshll.u32 %s281_s20, 4  ;;  %s41_s19 = int_to_ptr.vmem [resolvable:$true] %s40_s19  ;;  %s29_s21 = int_to_ptr.vmem [resolvable:$true] %s28_s21 }
   0x6   :  { %s150_s24 = scalar_lea.hbm %s407_s2, 256 }
   0x7   :  { %p151_p0 = scmp.ne.s32.totalorder %s407_s2, %s150_s24  ;;  %p154_p1 = scmp.lt.u32.totalorder %s150_s24, %s407_s2 }
   0x9   :  { %p156_p2 = pnand %p154_p1, %p151_p0 }
   0xb   :  { %159 = shalt.err (!%p156_p2)
}
   0xc   :  { %s160_s29 = scalar_lea.vmem %s41_s19, 256  ;;  %p165_p4 = scmp.lt.s32.totalorder %s41_s19, %s41_s19 }
   0xd   :  { %p161_p3 = scmp.ne.s32.totalorder %s41_s19, %s160_s29  ;;  %p166_p5 = scmp.lt.s32.totalorder %s160_s29, %s160_s29 }
   0xf   :  { %p167_p6 = por %p166_p5, %p165_p4 }
  0x11   :  { %p168_p7 = pnand %p167_p6, %p161_p3 }
  0x13   :  { %171 = shalt.err (!%p168_p7)
}
  0x14   :  { %s282_s30 = smov 128   ;;  %s283_s6 = smov 8  }
  0x15   :  { %46 = dma.hbm_to_vmem [thread:$0]  %s407_s2, 256, %s41_s19, [#allocation8], %s282_s30, %s282_s30, %s283_s6  }
  0x16   :  { %s172_s11 = scalar_lea.hbm %s405_s0, 16 }
  0x17   :  { %p173_p8 = scmp.ne.s32.totalorder %s405_s0, %s172_s11  ;;  %p176_p9 = scmp.lt.u32.totalorder %s172_s11, %s405_s0 }
  0x19   :  { %p178_p10 = pnand %p176_p9, %p173_p8 }
  0x1b   :  { %181 = shalt.err (!%p178_p10)
}
  0x1c   :  { %s284_s16 = smov [#allocation2]   ;;  %s182_s20 = scalar_lea.hbm %s406_s1, 256 }
  0x1d   :  { %22 = dma.hbm_to_smem %s405_s0, 16, %s284_s16, [#allocation5]  }
  0x1e   :  { %p183_p11 = scmp.ne.s32.totalorder %s406_s1, %s182_s20  ;;  %p186_p12 = scmp.lt.u32.totalorder %s182_s20, %s406_s1 }
  0x20   :  { %p188_p13 = pnand %p186_p12, %p183_p11 }
  0x22   :  { %191 = shalt.err (!%p188_p13)
}
  0x23   :  { %s192_s26 = scalar_lea.vmem %s29_s21, 256  ;;  %p197_p1 = scmp.lt.s32.totalorder %s29_s21, %s29_s21 }
  0x24   :  { %p193_p0 = scmp.ne.s32.totalorder %s29_s21, %s192_s26  ;;  %p198_p2 = scmp.lt.s32.totalorder %s192_s26, %s192_s26 }
  0x26   :  { %p199_p3 = por %p198_p2, %p197_p1 }
  0x28   :  { %p200_p4 = pnand %p199_p3, %p193_p0 }
  0x2a   :  { %203 = shalt.err (!%p200_p4)
}
  0x2b   :  { %34 = dma.hbm_to_vmem [thread:$0]  %s406_s1, 256, %s29_s21, [#allocation3], %s282_s30, %s282_s30, %s283_s6  }
  0x2c   :  { %s285_s28 = smov [#allocation9]   ;;  %s286_s7 = smov [#allocation10]  }
  0x2d   :  { %s52_s29 = sshll.u32 %s285_s28, 4  ;;  %s64_s8 = sshll.u32 %s286_s7, 4  ;;  %s53_s29 = int_to_ptr.vmem [resolvable:$true] %s52_s29  ;;  %s65_s8 = int_to_ptr.vmem [resolvable:$true] %s64_s8 }
  0x2e   :  { %s204_s11 = scalar_lea.hbm %s408_s3, 256 }
  0x2f   :  { %p205_p5 = scmp.ne.s32.totalorder %s408_s3, %s204_s11  ;;  %p208_p6 = scmp.lt.u32.totalorder %s204_s11, %s408_s3 }
  0x31   :  { %p210_p7 = pnand %p208_p6, %p205_p5 }
  0x33   :  { %213 = shalt.err (!%p210_p7)
}
  0x34   :  { %s214_s1 = scalar_lea.vmem %s53_s29, 256  ;;  %p219_p9 = scmp.lt.s32.totalorder %s53_s29, %s53_s29 }
  0x35   :  { %p215_p8 = scmp.ne.s32.totalorder %s53_s29, %s214_s1  ;;  %p220_p10 = scmp.lt.s32.totalorder %s214_s1, %s214_s1 }
  0x37   :  { %p221_p11 = por %p220_p10, %p219_p9 }
  0x39   :  { %p222_p12 = pnand %p221_p11, %p215_p8 }
  0x3b   :  { %225 = shalt.err (!%p222_p12)
}
  0x3c   :  { %58 = dma.hbm_to_vmem [thread:$0]  %s408_s3, 256, %s53_s29, [#allocation8], %s282_s30, %s282_s30, %s283_s6  }
  0x3d   :  { %s226_s2 = scalar_lea.hbm %s409_s4, 256 }
  0x3e   :  { %p227_p13 = scmp.ne.s32.totalorder %s409_s4, %s226_s2  ;;  %p230_p0 = scmp.lt.u32.totalorder %s226_s2, %s409_s4 }
  0x40   :  { %p232_p1 = pnand %p230_p0, %p227_p13 }
  0x42   :  { %235 = shalt.err (!%p232_p1)
}
  0x43   :  { %s236_s24 = scalar_lea.vmem %s65_s8, 256  ;;  %p241_p3 = scmp.lt.s32.totalorder %s65_s8, %s65_s8 }
  0x44   :  { %p237_p2 = scmp.ne.s32.totalorder %s65_s8, %s236_s24  ;;  %p242_p4 = scmp.lt.s32.totalorder %s236_s24, %s236_s24 }
  0x46   :  { %p243_p5 = por %p242_p4, %p241_p3 }
  0x48   :  { %p244_p6 = pnand %p243_p5, %p237_p2 }
  0x4a   :  { %247 = shalt.err (!%p244_p6)
}
  0x4b   :  { %70 = dma.hbm_to_vmem [thread:$0]  %s409_s4, 256, %s65_s8, [#allocation11], %s282_s30, %s282_s30, %s283_s6  }
  0x4c   :  { %270 = dma.done.wait [#allocation5], 16  }
  0x4d   :  { %271 = vsyncadd [#allocation5], 4294967280 }
  0x4e   :  { %272 = dma.done.wait [#allocation3], 256  }
  0x4f   :  { %273 = vsyncadd [#allocation3], 4294967040 }
  0x50   :  { %274 = dma.done.wait [#allocation8], 512  }
  0x51   :  { %275 = vsyncadd [#allocation8], 4294966784 }
  0x52   :  { %276 = dma.done.wait [#allocation11], 256  }
  0x53   :  { %277 = vsyncadd [#allocation11], 4294967040 }
  0x54   :  { %86 = sfence }
  0x55   :  { %s87_s26 = sld [smem:[#allocation2]]  ;;  %s139_s0 = sld [smem:[#allocation2 + $0x1]]  ;;  %v88_v0 = vld [vmem:[#allocation6] sm:$0xff]  ;;  %v94_v1 = vld [vmem:[#allocation7] sm:$0xff]  ;;  %v89_v3 = vld [vmem:[#allocation6 + $0x8] sm:$0xff] }
  0x56   :  { %s140_s27 = sld [smem:[#allocation2 + $0x2]]  ;;  %s141_s28 = sld [smem:[#allocation2 + $0x3]]  ;;  %v102_v2 = vld [vmem:[#allocation9] sm:$0xff]  ;;  %v95_v4 = vld [vmem:[#allocation7 + $0x8] sm:$0xff]  ;;  %v110_v7 = vld [vmem:[#allocation10] sm:$0xff] }
  0x57   :  { %v103_v8 = vld [vmem:[#allocation9 + $0x8] sm:$0xff]  ;;  %v111_v13 = vld [vmem:[#allocation10 + $0x8] sm:$0xff]  ;;  %s287_s4 = smov [#allocation12]  }
  0x58   :  { %s124_s29 = sshll.u32 %s287_s4, 4  ;;  %s125_s29 = int_to_ptr.vmem [resolvable:$true] %s124_s29 }
  0x59   :  { %s248_s7 = scalar_lea.vmem %s125_s29, 256  ;;  %p253_p8 = scmp.lt.s32.totalorder %s125_s29, %s125_s29 }
  0x5a   :  { %p249_p7 = scmp.ne.s32.totalorder %s125_s29, %s248_s7  ;;  %p254_p9 = scmp.lt.s32.totalorder %s248_s7, %s248_s7 }
  0x5b   :  { %v90_v5 = vstv %s87_s26  ;;  %v96_v6 = vstv %s139_s0 }
  0x5c   :  { %v91_v9 = vmul.f32 %v90_v5, %v88_v0  ;;  %v97_v10 = vmul.f32 %v96_v6, %v94_v1  ;;  %v104_v11 = vstv %s140_s27  ;;  %v112_v12 = vstv %s141_s28  ;;  %p255_p10 = por %p254_p9, %p253_p8 }
  0x5d   :  { %v105_v14 = vmul.f32 %v104_v11, %v102_v2  ;;  %v92_v15 = vmul.f32 %v90_v5, %v89_v3  ;;  %v98_v16 = vmul.f32 %v96_v6, %v95_v4  ;;  %v113_v18 = vmul.f32 %v112_v12, %v110_v7 }
  0x5e   :  { %v99_v17 = vadd.f32 %v97_v10, %v91_v9  ;;  %v106_v19 = vmul.f32 %v104_v11, %v103_v8  ;;  %v114_v21 = vmul.f32 %v112_v12, %v111_v13  ;;  %p256_p11 = pnand %p255_p10, %p249_p7 }
  0x5f   :  { %v100_v20 = vadd.f32 %v98_v16, %v92_v15 }
  0x60   :  { %v107_v22 = vadd.f32 %v105_v14, %v99_v17 }
  0x61   :  { %v108_v23 = vadd.f32 %v106_v19, %v100_v20 }
  0x62   :  { %v115_v24 = vadd.f32 %v113_v18, %v107_v22 }
  0x63   :  { %v116_v25 = vadd.f32 %v114_v21, %v108_v23 }
  0x64   :  { %117 = vst [vmem:[#allocation12] sm:$0xff] %v115_v24 }
  0x65   :  { %118 = vst [vmem:[#allocation12 + $0x8] sm:$0xff] %v116_v25 }
  0x66   :  { %259 = shalt.err (!%p256_p11)
}
  0x67   :  { %s260_s10 = scalar_lea.hbm %s410_s5, 256 }
  0x68   :  { %p261_p12 = scmp.ne.s32.totalorder %s410_s5, %s260_s10  ;;  %p264_p13 = scmp.lt.u32.totalorder %s260_s10, %s410_s5 }
  0x6a   :  { %p266_p0 = pnand %p264_p13, %p261_p12 }
  0x6c   :  { %269 = shalt.err (!%p266_p0)
}
  0x6d   :  { %130 = dma.vmem_to_hbm [thread:$0]  %s125_s29, 256, %s410_s5, [#allocation4], %s282_s30, %s282_s30, %s283_s6  }
  0x6e   :  { %278 = dma.done.wait [#allocation4], 256  }
  0x6f   :  { %279 = vsyncadd [#allocation4], 4294967040 }
  0x70   :  { %134 = vsyncpa [#allocation3], 1 }
  0x71   :  { %135 = vsyncpa [#allocation8], 1 }
  0x72   :  { %136 = vsyncpa [#allocation11], 1 }
  0x73   :  { %137 = vsyncpa [#allocation4], 1 }
  0x74   :  { %138 = vsyncpa [#allocation5], 1 }

</bundles_post_ra>
